<compile_context>
chip_gen: v7x
topology: tpu7x:2x2x1
jax: 0.10.0
libtpu: 0.0.40
codegen_flags: <defaults>
</compile_context>

<pallas_src>
import functools

import jax
import jax.numpy as jnp
from jax import lax
from jax.experimental import pallas as pl
from jax.experimental.pallas import tpu as pltpu

_EPS = 1e-12            # F.normalize default eps (clamps each L2 norm)
_EPS_SQ = _EPS * _EPS   # same clamp applied to each squared norm
_SUBLANES = 8
_LANES = 128


def _wcd_kernel(*refs, total_rows, tile_rows, tiles_per_split, padded,
                feature_dim, scalar_weight):
    if scalar_weight is None:
        w_ref, pred_ref, target_ref, out_ref = refs
    else:
        pred_ref, target_ref, out_ref = refs

    c = pl.program_id(0)   # split (TensorCore) index
    j = pl.program_id(1)   # row-tile index within the split

    @pl.when(j == 0)
    def _init():
        out_ref[...] = jnp.zeros_like(out_ref)

    p = pred_ref[...].astype(jnp.float32)     # (TM, D)
    t = target_ref[...].astype(jnp.float32)   # (TM, D)

    # sum_d w_d * (1 - pn_d * tn_d)
    #   = sum(w) - sum(w * p * t) / (max(||p||, eps) * max(||t||, eps))
    pp = jnp.sum(p * p, axis=-1, keepdims=True)   # (TM, 1)
    tt = jnp.sum(t * t, axis=-1, keepdims=True)   # (TM, 1)
    # Clamp each squared norm to eps^2 (== clamping each norm to eps); one rsqrt
    # on the narrow (TM, 1) column -> EUP slot.
    inv = lax.rsqrt(jnp.maximum(pp, _EPS_SQ) * jnp.maximum(tt, _EPS_SQ))

    if scalar_weight is None:
        w = w_ref[...].astype(jnp.float32)                      # (1, D)
        wpt = jnp.sum(w * p * t, axis=-1, keepdims=True)        # (TM, 1)
        loss_col = jnp.sum(w) - wpt * inv                       # (TM, 1)
    else:
        # Scalar-weight fast path: no (TM,D) weight multiply, no weight load.
        pt = jnp.sum(p * t, axis=-1, keepdims=True)              # (TM, 1)
        loss_col = scalar_weight * (float(feature_dim) - pt * inv)

    row_start = (c * tiles_per_split + j) * tile_rows            # scalar (unclamped)

    if padded:
        is_partial = row_start + tile_rows > total_rows

        @pl.when(is_partial)
        def _acc_masked():
            row_ids = row_start + lax.broadcasted_iota(jnp.int32, loss_col.shape, 0)
            masked = jnp.where(row_ids < total_rows, loss_col, 0.0)
            out_ref[...] += jnp.sum(masked)

        @pl.when(jnp.logical_not(is_partial))
        def _acc_full():
            out_ref[...] += jnp.sum(loss_col)
    else:
        out_ref[...] += jnp.sum(loss_col)


def weighted_cosine_dissimilarity(pred, target, weight=1.0, *, tile_rows=None):
    """Pallas implementation of WeightedCosineDissimilarity.forward (reduce=mean).

    `weight` may be a Python scalar (fast path), a 0-d array, or a per-feature
    vector of shape (D,).
    """
    assert pred.shape == target.shape
    d = pred.shape[-1]
    b = 1
    for s in pred.shape[:-1]:
        b *= s

    pred2 = jnp.reshape(pred, (b, d))
    target2 = jnp.reshape(target, (b, d))

    # Scalar-weight fast path: bake the constant into the kernel.
    scalar_weight = None
    w2 = None
    if isinstance(weight, (int, float)):
        scalar_weight = float(weight)
    else:
        w = jnp.asarray(weight, dtype=jnp.float32)
        if w.ndim == 0:
            w2 = jnp.full((1, d), w, dtype=jnp.float32)
        else:
            w2 = jnp.reshape(w, (1, d)).astype(jnp.float32)

    # --- VMEM-aware tile sizing -------------------------------------------------
    # Per row of a tile:
    #   inputs          : 2 arrays x 2 pipeline buffers x D x itemsize
    #   f32 temporaries : casts of p/t + elementwise products  ~ 4 x D x 4 bytes
    itemsize = max(jnp.dtype(pred2.dtype).itemsize, jnp.dtype(target2.dtype).itemsize)
    bytes_per_row = 4 * d * itemsize + 4 * d * 4

    try:
        vmem_cap = int(pltpu.get_tpu_info().vmem_capacity_bytes)
    except Exception:
        vmem_cap = 64 * 1024 * 1024   # conservative (v7x-class) fallback
    if vmem_cap <= 64 * 1024 * 1024:          # v7x: 64 MiB VMEM per TensorCore
        working_set_budget = 30 * 1024 * 1024
        vmem_limit = 48 * 1024 * 1024
    else:                                      # v5e / v6e: 128 MiB physical VMEM
        working_set_budget = 48 * 1024 * 1024
        vmem_limit = 64 * 1024 * 1024

    tm_cap = (working_set_budget // bytes_per_row) // _SUBLANES * _SUBLANES
    tm_cap = max(_SUBLANES, min(1024, tm_cap))

    if tile_rows is not None:
        tm = max(1, min(int(tile_rows), b))
        if tm != b:   # (8,128) sublane rule: round up; a full-extent block is always legal
            tm = ((tm + _SUBLANES - 1) // _SUBLANES) * _SUBLANES
    elif b <= tm_cap:
        tm = b                      # single full block (full-dim block is always legal)
    else:
        tm = tm_cap                 # multiple of 8

    tiles_total = pl.cdiv(b, tm)
    num_splits = 2 if tiles_total >= 2 else 1     # 2 TCs on v7x; harmless on 1-TC chips
    tiles_per_split = pl.cdiv(tiles_total, num_splits)
    padded = (num_splits * tiles_per_split * tm) > b
    clamp_needed = (num_splits * tiles_per_split) > tiles_total
    last_tile = tiles_total - 1

    def row_block(c, j):
        g = c * tiles_per_split + j
        if clamp_needed:
            g = jnp.minimum(g, last_tile)   # keep fully-out-of-range tiles in bounds
        return (g, 0)

    kernel = functools.partial(
        _wcd_kernel, total_rows=b, tile_rows=tm, tiles_per_split=tiles_per_split,
        padded=padded, feature_dim=d, scalar_weight=scalar_weight)

    in_specs = []
    inputs = []
    if scalar_weight is None:
        in_specs.append(pl.BlockSpec((1, d), lambda c, j: (0, 0)))   # resident weight
        inputs.append(w2)
    in_specs += [
        pl.BlockSpec((tm, d), row_block),   # pred rows (pipelined)
        pl.BlockSpec((tm, d), row_block),   # target rows (pipelined)
    ]
    inputs += [pred2, target2]

    # One (8, 128) accumulator block per split; value is replicated across the block.
    out = pl.pallas_call(
        kernel,
        out_shape=jax.ShapeDtypeStruct((num_splits * _SUBLANES, _LANES), jnp.float32),
        grid=(num_splits, tiles_per_split),
        in_specs=in_specs,
        out_specs=pl.BlockSpec((_SUBLANES, _LANES), lambda c, j: (c, 0)),
        compiler_params=pltpu.CompilerParams(
            dimension_semantics=("parallel", "arbitrary"),
            vmem_limit_bytes=vmem_limit,
        ),
    )(*inputs)

    per_split = out[0::_SUBLANES, 0]          # one replicated partial sum per split
    return jnp.sum(per_split) / b


def _reference(pred, target, weight=1.0):
    p = pred.astype(jnp.float32)
    t = target.astype(jnp.float32)
    pn = p / jnp.maximum(jnp.linalg.norm(p, axis=-1, keepdims=True), _EPS)
    tn = t / jnp.maximum(jnp.linalg.norm(t, axis=-1, keepdims=True), _EPS)
    return jnp.mean(jnp.sum(weight * (1.0 - pn * tn), axis=-1))


if __name__ == "__main__":
    key = jax.random.PRNGKey(0)
    k1, k2, k3, k4 = jax.random.split(key, 4)

    # batch=2, seq=8, hidden=32 (normalize/reduce over hidden), scalar weight fast path.
    pred = jax.random.normal(k1, (2, 8, 32), dtype=jnp.float32)
    target = jax.random.normal(k2, (2, 8, 32), dtype=jnp.float32)
    weight = 0.75

    out = weighted_cosine_dissimilarity(pred, target, weight)
    out = jax.block_until_ready(out)
    ref = _reference(pred, target, weight)
    assert jnp.allclose(out, ref, atol=1e-4, rtol=1e-4), (out, ref)

    # Tiled path: per-feature weight vector, 2-way split grid, partial last tile.
    pred2 = jax.random.normal(k3, (3, 6, 32), dtype=jnp.float32)
    target2 = jax.random.normal(k4, (3, 6, 32), dtype=jnp.float32)
    wvec = jnp.linspace(0.5, 1.5, 32, dtype=jnp.float32)
    out2 = weighted_cosine_dissimilarity(pred2, target2, wvec, tile_rows=8)
    out2 = jax.block_until_ready(out2)
    ref2 = _reference(pred2, target2, wvec)
    assert jnp.allclose(out2, ref2, atol=1e-4, rtol=1e-4), (out2, ref2)

    # TODO(synk): only reduce_method=torch.mean (the module default) is implemented.
    # TODO(synk): lane-packing for D < 128 and pl.Buffered(3) sweep left out; enable
    #             only if profiling shows lane/DMA under-utilization for small D.
    print("KERNEL_OK")
</pallas_src>

<mosaic_0001>
module attributes {stable_mosaic.version = 11 : i64} {
  func.func @_wcd_kernel(%arg0: i32, %arg1: i32, %arg2: memref<16x32xf32, #tpu.memory_space<vmem>>, %arg3: memref<16x32xf32, #tpu.memory_space<vmem>>, %arg4: memref<8x128xf32, #tpu.memory_space<vmem>>) attributes {dimension_semantics = [#tpu.dimension_semantics<parallel>, #tpu.dimension_semantics<arbitrary>], iteration_bounds = array<i64: 1, 1>, scalar_prefetch = 0 : i64, scratch_operands = 0 : i64, tpu.core_type = #tpu.core_type<tc>, window_params = [{transform_indices = @transform_0, window_bounds = array<i64: 16, 32>}, {transform_indices = @transform_1, window_bounds = array<i64: 16, 32>}, {transform_indices = @transform_2, window_bounds = array<i64: 8, 128>}]} {
    %c0_i32 = arith.constant 0 : i32
    %0 = arith.cmpi eq, %arg1, %c0_i32 : i32
    %1 = arith.extui %0 : i1 to i32
    %c0_i32_0 = arith.constant 0 : i32
    %2 = arith.cmpi ne, %1, %c0_i32_0 : i32
    scf.if %2 {
      %cst_15 = arith.constant 0.000000e+00 : f32
      %33 = vector.broadcast %cst_15 : f32 to vector<8x128xf32>
      %c0_16 = arith.constant 0 : index
      %c0_17 = arith.constant 0 : index
      %34 = vector.load %arg4[%c0_16, %c0_17] : memref<8x128xf32, #tpu.memory_space<vmem>>, vector<8x128xf32>
      tpu.vector_store %arg4[%c0_16, %c0_17], %33 {strides = array<i32>} : memref<8x128xf32, #tpu.memory_space<vmem>>, vector<8x128xf32>,
    } else {
    }
    %c0 = arith.constant 0 : index
    %c0_1 = arith.constant 0 : index
    %3 = vector.load %arg2[%c0, %c0_1] : memref<16x32xf32, #tpu.memory_space<vmem>>, vector<16x32xf32>
    %c0_2 = arith.constant 0 : index
    %c0_3 = arith.constant 0 : index
    %4 = vector.load %arg3[%c0_2, %c0_3] : memref<16x32xf32, #tpu.memory_space<vmem>>, vector<16x32xf32>
    %5 = arith.mulf %3, %3 : vector<16x32xf32>
    %cst = arith.constant dense<0.000000e+00> : vector<16xf32>
    %6 = vector.multi_reduction <add>, %5, %cst [1] : vector<16x32xf32> to vector<16xf32>
    %7 = vector.shape_cast %6 : vector<16xf32> to vector<16x1xf32>
    %8 = arith.mulf %4, %4 : vector<16x32xf32>
    %cst_4 = arith.constant dense<0.000000e+00> : vector<16xf32>
    %9 = vector.multi_reduction <add>, %8, %cst_4 [1] : vector<16x32xf32> to vector<16xf32>
    %10 = vector.shape_cast %9 : vector<16xf32> to vector<16x1xf32>
    %cst_5 = arith.constant 1.000000e-24 : f32
    %11 = vector.broadcast %cst_5 : f32 to vector<16x1xf32>
    %12 = arith.maximumf %7, %11 : vector<16x1xf32>
    %cst_6 = arith.constant 1.000000e-24 : f32
    %13 = vector.broadcast %cst_6 : f32 to vector<16x1xf32>
    %14 = arith.maximumf %10, %13 : vector<16x1xf32>
    %15 = arith.mulf %12, %14 : vector<16x1xf32>
    %16 = math.rsqrt %15 : vector<16x1xf32>
    %17 = arith.mulf %3, %4 : vector<16x32xf32>
    %cst_7 = arith.constant dense<0.000000e+00> : vector<16xf32>
    %18 = vector.multi_reduction <add>, %17, %cst_7 [1] : vector<16x32xf32> to vector<16xf32>
    %19 = vector.shape_cast %18 : vector<16xf32> to vector<16x1xf32>
    %20 = arith.mulf %19, %16 : vector<16x1xf32>
    %cst_8 = arith.constant 3.200000e+01 : f32
    %21 = vector.broadcast %cst_8 : f32 to vector<16x1xf32>
    %22 = arith.subf %21, %20 : vector<16x1xf32>
    %cst_9 = arith.constant 7.500000e-01 : f32
    %23 = vector.broadcast %cst_9 : f32 to vector<16x1xf32>
    %24 = arith.mulf %23, %22 : vector<16x1xf32>
    %c0_10 = arith.constant 0 : index
    %c0_11 = arith.constant 0 : index
    %25 = vector.load %arg4[%c0_10, %c0_11] : memref<8x128xf32, #tpu.memory_space<vmem>>, vector<8x128xf32>
    %26 = vector.shape_cast %24 : vector<16x1xf32> to vector<1x16x1xf32>
    %cst_12 = arith.constant dense<0.000000e+00> : vector<1xf32>
    %27 = vector.multi_reduction <add>, %26, %cst_12 [1, 2] : vector<1x16x1xf32> to vector<1xf32>
    %28 = vector.shape_cast %27 : vector<1xf32> to vector<1x1x1xf32>
    %29 = vector.extract %28[0, 0, 0] : f32 from vector<1x1x1xf32>
    %30 = vector.broadcast %29 : f32 to vector<8x128xf32>
    %31 = arith.addf %25, %30 : vector<8x128xf32>
    %c0_13 = arith.constant 0 : index
    %c0_14 = arith.constant 0 : index
    %32 = vector.load %arg4[%c0_13, %c0_14] : memref<8x128xf32, #tpu.memory_space<vmem>>, vector<8x128xf32>
    tpu.vector_store %arg4[%c0_13, %c0_14], %31 {strides = array<i32>} : memref<8x128xf32, #tpu.memory_space<vmem>>, vector<8x128xf32>,
    return
  }
  func.func @transform_0(%arg0: i32, %arg1: i32) -> (i32, i32) {
    %c1_i32 = arith.constant 1 : i32
    %0 = arith.muli %arg0, %c1_i32 : i32
    %1 = arith.addi %0, %arg1 : i32
    %c0_i32 = arith.constant 0 : i32
    %c0_i32_0 = arith.constant 0 : i32
    return %1, %c0_i32 : i32, i32
  }
  func.func @transform_1(%arg0: i32, %arg1: i32) -> (i32, i32) {
    %c1_i32 = arith.constant 1 : i32
    %0 = arith.muli %arg0, %c1_i32 : i32
    %1 = arith.addi %0, %arg1 : i32
    %c0_i32 = arith.constant 0 : i32
    %c0_i32_0 = arith.constant 0 : i32
    return %1, %c0_i32 : i32, i32
  }
  func.func @transform_2(%arg0: i32, %arg1: i32) -> (i32, i32) {
    %c0_i32 = arith.constant 0 : i32
    %c0_i32_0 = arith.constant 0 : i32
    return %arg0, %c0_i32 : i32, i32
  }
}

</mosaic_0001>

<bundles_post_ra>
// kernel: tpu_custom_call.1
= control target key start
LH: loop header
LB: loop body
LE: loop exit
PB: predicated region body
PF: predicated region fallthrough
CT: control target
= control target key end

     0   :  { %7 = vsyncpa [#allocation3], 0  ;;  %s279_s0 = inlined_call_operand.hbm [shape: f32[16,32], index: 0, kind: input, shape index: {}]   ;;  %s280_s1 = inlined_call_operand.hbm [shape: f32[16,32], index: 1, kind: input, shape index: {}]   ;;  %s281_s2 = inlined_call_operand.hbm [shape: f32[8,128], index: 2, kind: output, shape index: {}]  }
   0x1   :  { %8 = vsyncpa [#allocation6], 0 }
   0x2   :  { %9 = vsyncpa [#allocation4], 0  ;;  %s217_s9 = smov [#allocation2]   ;;  %s145_s13 = scalar_lea.hbm %s279_s0, 256 }
   0x3   :  { %s19_s10 = sshll.u32 %s217_s9, 4  ;;  %p146_p0 = scmp.ne.s32.totalorder %s279_s0, %s145_s13  ;;  %s20_s10 = int_to_ptr.vmem [resolvable:$true] %s19_s10 }
   0x4   :  { %p149_p1 = scmp.lt.u32.totalorder %s145_s13, %s279_s0 }
   0x6   :  { %p151_p2 = pnand %p149_p1, %p146_p0 }
   0x8   :  { %154 = shalt.err (!%p151_p2)
}
   0x9   :  { %s155_s18 = scalar_lea.vmem %s20_s10, 256  ;;  %p160_p4 = scmp.lt.s32.totalorder %s20_s10, %s20_s10 }
   0xa   :  { %p156_p3 = scmp.ne.s32.totalorder %s20_s10, %s155_s18  ;;  %p161_p5 = scmp.lt.s32.totalorder %s155_s18, %s155_s18 }
   0xc   :  { %p162_p6 = por %p161_p5, %p160_p4 }
   0xe   :  { %p163_p7 = pnand %p162_p6, %p156_p3 }
  0x10   :  { %166 = shalt.err (!%p163_p7)
}
  0x11   :  { %s218_s19 = smov 128   ;;  %s219_s20 = smov 8  }
  0x12   :  { %25 = dma.hbm_to_vmem [thread:$0]  %s279_s0, 256, %s20_s10, [#allocation3], %s218_s19, %s218_s19, %s219_s20  }
  0x13   :  { %s220_s23 = smov [#allocation5]   ;;  %s167_s27 = scalar_lea.hbm %s280_s1, 256 }
  0x14   :  { %s35_s24 = sshll.u32 %s220_s23, 4  ;;  %p168_p8 = scmp.ne.s32.totalorder %s280_s1, %s167_s27  ;;  %s36_s24 = int_to_ptr.vmem [resolvable:$true] %s35_s24 }
  0x15   :  { %p171_p9 = scmp.lt.u32.totalorder %s167_s27, %s280_s1 }
  0x17   :  { %p173_p10 = pnand %p171_p9, %p168_p8 }
  0x19   :  { %176 = shalt.err (!%p173_p10)
}
  0x1a   :  { %s177_s4 = scalar_lea.vmem %s36_s24, 256  ;;  %p182_p12 = scmp.lt.s32.totalorder %s36_s24, %s36_s24 }
  0x1b   :  { %p178_p11 = scmp.ne.s32.totalorder %s36_s24, %s177_s4  ;;  %p183_p13 = scmp.lt.s32.totalorder %s177_s4, %s177_s4 }
  0x1d   :  { %p184_p0 = por %p183_p13, %p182_p12 }
  0x1f   :  { %p185_p1 = pnand %p184_p0, %p178_p11 }
  0x21   :  { %188 = shalt.err (!%p185_p1)
}
  0x22   :  { %41 = dma.hbm_to_vmem [thread:$0]  %s280_s1, 256, %s36_s24, [#allocation6], %s218_s19, %s218_s19, %s219_s20  }
  0x23   :  { %211 = dma.done.wait [#allocation3], 256  }
  0x24   :  { %212 = vsyncadd [#allocation3], 4294967040 }
  0x25   :  { %213 = dma.done.wait [#allocation6], 256  }
  0x26   :  { %214 = vsyncadd [#allocation6], 4294967040  ;;  %v59_v0 = vld [vmem:[#allocation5] sm:$0xff]  ;;  %vm63_vm0 = vcmask 261120   ;;  %v57_v1 = vld [vmem:[#allocation2] sm:$0xff]  ;;  %vm101_vm1 = vcmask 7168  }
  0x27   :  { %v60_v2 = vld [vmem:[#allocation5 + $0x8] sm:$0xff]  ;;  %v70_v3 = vmul.f32 %v59_v0, %v59_v0  ;;  %v61_v4 = vmul.f32 %v57_v1, %v57_v1  ;;  %v58_v6 = vld [vmem:[#allocation2 + $0x8] sm:$0xff]  ;;  %v86_v12 = vmul.f32 %v59_v0, %v57_v1  ;;  %s221_s1 = smov [#allocation7]  }
  0x28   :  { %v71_v5 = vmul.f32 %v60_v2, %v60_v2  ;;  %v62_v7 = vmul.f32 %v58_v6, %v58_v6  ;;  %v87_v13 = vmul.f32 %v60_v2, %v58_v6  ;;  %s123_s6 = sshll.u32 %s221_s1, 4  ;;  %s124_s6 = int_to_ptr.vmem [resolvable:$true] %s123_s6 }
  0x29   :  { %v72_v8 = vsel %vm63_vm0, %v70_v3, 0.0  ;;  %v64_v9 = vsel %vm63_vm0, %v61_v4, 0.0  ;;  %v88_v14 = vsel %vm63_vm0, %v86_v12, 0.0  ;;  %s189_s8 = scalar_lea.vmem %s124_s6, 128  ;;  %p194_p3 = scmp.lt.s32.totalorder %s124_s6, %s124_s6 }
  0x2a   :  { %73 = vadd.xlane.f32.xlu1 %v72_v8  ;;  %65 = vadd.xlane.f32.xlu0 %v64_v9  ;;  %v75_v10 = vsel %vm63_vm0, %v71_v5, 0.0  ;;  %v67_v11 = vsel %vm63_vm0, %v62_v7, 0.0  ;;  %v91_v15 = vsel %vm63_vm0, %v87_v13, 0.0  ;;  %p190_p2 = scmp.ne.s32.totalorder %s124_s6, %s189_s8  ;;  %p195_p4 = scmp.lt.s32.totalorder %s189_s8, %s189_s8 }
  0x2c   :  { %p196_p5 = por %p195_p4, %p194_p3 }
  0x2e   :  { %76 = vadd.xlane.f32.xlu1 %v75_v10  ;;  %68 = vadd.xlane.f32.xlu0 %v67_v11  ;;  %p197_p6 = pnand %p196_p5, %p190_p2 }
  0x32   :  { %89 = vadd.xlane.f32.xlu0 %v88_v14  ;;  %92 = vadd.xlane.f32.xlu1 %v91_v15 }
  0xb7   :  { %v74_v16 = vpop.xlane.xlu1 %73  ;;  %v66_v17 = vpop.xlane.xlu0 %65 }
  0xb8   :  { %v80_v18 = vmax.f32 %v74_v16, 1e-24  ;;  %v78_v19 = vmax.f32 %v66_v17, 1e-24 }
  0xba   :  { %v82_v20 = vmul.f32 %v80_v18, %v78_v19 }
  0xbb   :  { %v77_v21 = vpop.xlane.xlu1 %76  ;;  %v69_v22 = vpop.xlane.xlu0 %68 }
  0xbc   :  { %141 = vrsqrt.f32 %v82_v20  ;;  %v81_v23 = vmax.f32 %v77_v21, 1e-24  ;;  %v79_v24 = vmax.f32 %v69_v22, 1e-24 }
  0xbe   :  { %v83_v25 = vmul.f32 %v81_v23, %v79_v24 }
  0xbf   :  { %v90_v26 = vpop.xlane.xlu0 %89  ;;  %v93_v29 = vpop.xlane.xlu1 %92 }
  0xc0   :  { %143 = vrsqrt.f32 %v83_v25 }
  0xc6   :  { %v142_v27 = vpop.eup %141 }
  0xc7   :  { %v94_v28 = vmul.f32 %v142_v27, %v90_v26 }
  0xc9   :  { %v96_v30 = vsub.f32 32.0, %v94_v28 }
  0xca   :  { %v144_v31 = vpop.eup %143 }
  0xcb   :  { %v95_v32 = vmul.f32 %v144_v31, %v93_v29  ;;  %v98_v33 = vmul.f32 0.75, %v96_v30 }
  0xcd   :  { %v97_v34 = vsub.f32 32.0, %v95_v32  ;;  %v102_v36 = vsel %vm101_vm1, %v98_v33, 0.0 }
  0xcf   :  { %v99_v35 = vmul.f32 0.75, %v97_v34 }
  0xd1   :  { %v103_v37 = vsel %vm101_vm1, %v99_v35, 0.0 }
  0xd2   :  { %v104_v38 = vadd.f32 %v103_v37, %v102_v36 }
  0xd4   :  { %105 = vadd.xlane.f32.xlu0 %v104_v38 }
 0x161   :  { %v106_v39 = vpop.xlane.xlu0 %105 }
 0x162   :  { %v107_v40 = vrot.slane %v106_v39, 4 }
 0x164   :  { %v108_v41 = vadd.f32 %v107_v40, %v106_v39 }
 0x166   :  { %v109_v42 = vrot.slane %v108_v41, 2 }
 0x168   :  { %v110_v43 = vadd.f32 %v109_v42, %v108_v41 }
 0x16a   :  { %v111_v44 = vrot.slane %v110_v43, 1 }
 0x16c   :  { %v112_v45 = vadd.f32 %v111_v44, %v110_v43 }
 0x16e   :  { %133 = vpush %v112_v45 }
 0x19f   :  { %s134_s7 = spop %133 }
 0x1a0   :  { %v114_v46 = vstv %s134_s7 }
 0x1a1   :  { %116 = vst [vmem:[#allocation7] sm:$0xff] %v114_v46 }
 0x1a2   :  { %200 = shalt.err (!%p197_p6)
}
 0x1a3   :  { %s201_s11 = scalar_lea.hbm %s281_s2, 128 }
 0x1a4   :  { %p202_p7 = scmp.ne.s32.totalorder %s281_s2, %s201_s11  ;;  %p205_p8 = scmp.lt.u32.totalorder %s201_s11, %s281_s2 }
 0x1a6   :  { %p207_p9 = pnand %p205_p8, %p202_p7 }
 0x1a8   :  { %210 = shalt.err (!%p207_p9)
}
 0x1a9   :  { %126 = dma.vmem_to_hbm [thread:$0]  %s124_s6, 128, %s281_s2, [#allocation4]  }
 0x1aa   :  { %215 = dma.done.wait [#allocation4], 128  }
 0x1ab   :  { %216 = vsyncadd [#allocation4], 4294967168 }
 0x1ac   :  { %130 = vsyncpa [#allocation3], 1 }
 0x1ad   :  { %131 = vsyncpa [#allocation6], 1 }
 0x1ae   :  { %132 = vsyncpa [#allocation4], 1 }

</bundles_post_ra>
